<compile_context>
chip_gen: v5e
topology: v5e:2x2
jax: 0.10.0
libtpu: 0.0.40
codegen_flags: <defaults>
</compile_context>

<pallas_src>
import functools

import jax
import jax.numpy as jnp
from jax.experimental import pallas as pl
from jax.experimental.pallas import tpu as pltpu

IMG_SIZE = (64, 64, 64)                              # (D, H, W)
BOX_SCALE_FACTOR = (0.1, 0.1, 0.1, 0.2, 0.2, 0.2)    # set to None/() to disable

_MAX_CHUNKS = 2                    # "parallel" megacore split on v7x; harmless on 1-TC chips
_TILE_VMEM_BUDGET = 2 * 1024 * 1024  # bytes per cls tile (Pallas double-buffers it)


def _argmax_tile_kernel(cls_ref, score_ref, idx_ref, *,
                        n_anchors, tile_n, num_tiles, tiles_per_chunk,
                        need_tail_mask, has_phantom_tiles):
    """Running (max, first-occurrence argmax) over anchor tiles of cls_heads."""
    c = pl.program_id(0)            # chunk axis ("parallel")
    k = pl.program_id(1)            # tile-within-chunk axis ("arbitrary" reduction)

    @pl.when(k == 0)
    def _():
        score_ref[...] = jnp.full(score_ref.shape, -jnp.inf, score_ref.dtype)
        idx_ref[...] = jnp.zeros(idx_ref.shape, idx_ref.dtype)

    logical_tile = c * tiles_per_chunk + k

    def _compute():
        tile = cls_ref[...]                                      # (B, TN)
        b, tn = tile.shape

        # Global anchor index of every lane in this logical tile. Only the tail
        # tile needs masking (static flag); phantom tiles are skipped below.
        lane = jax.lax.broadcasted_iota(jnp.int32, (b, tn), 1)
        gidx = lane + logical_tile * tile_n                      # (B, TN) int32
        if need_tail_mask:
            masked = jnp.where(gidx < n_anchors, tile, -jnp.inf)
        else:
            masked = tile

        # TODO(synk): when B < 8, fold part of the anchor axis into sublanes
        # ((B*8, TN/8)) to fill vregs; minor while the kernel is HBM-bound.
        tile_max = jnp.max(masked, axis=1, keepdims=True)        # (B, 1)
        hit = masked == tile_max
        tile_idx = jnp.min(jnp.where(hit, gidx, jnp.int32(n_anchors)),
                           axis=1, keepdims=True)                # first occurrence in tile

        run_max = score_ref[0]                                   # (B, 1)
        better = tile_max > run_max      # strict '>': earlier tile wins ties
        idx_ref[0] = jnp.where(better, tile_idx, idx_ref[0])
        score_ref[0] = jnp.where(better, tile_max, run_max)

    if has_phantom_tiles:
        @pl.when(logical_tile < num_tiles)
        def _():
            _compute()
    else:
        _compute()


def _argmax_pallas(cls_heads, *, max_tile_lanes=None):
    """Per-batch (max score, first-occurrence argmax) over the anchor axis."""
    B, N = cls_heads.shape
    lane_padded = pl.cdiv(N, 128) * 128

    if N < 128:
        tile_n = N                                # full-extent lane dim is allowed
    else:
        itemsize = jnp.dtype(cls_heads.dtype).itemsize
        budget_lanes = (_TILE_VMEM_BUDGET // (B * itemsize)) // 128 * 128
        tile_n = int(min(max(128, budget_lanes), lane_padded))
        if max_tile_lanes is not None:            # test hook / manual override
            tile_n = int(min(tile_n, max(128, (max_tile_lanes // 128) * 128)))

    num_tiles = pl.cdiv(N, tile_n)
    num_chunks = min(_MAX_CHUNKS, num_tiles)
    tiles_per_chunk = pl.cdiv(num_tiles, num_chunks)
    has_phantom_tiles = num_chunks * tiles_per_chunk > num_tiles
    need_tail_mask = (N % tile_n) != 0

    kernel = functools.partial(
        _argmax_tile_kernel,
        n_anchors=N, tile_n=tile_n, num_tiles=num_tiles,
        tiles_per_chunk=tiles_per_chunk,
        need_tail_mask=need_tail_mask, has_phantom_tiles=has_phantom_tiles)

    def cls_index_map(c, k):
        # Clamp so phantom logical tiles never issue an out-of-bounds DMA;
        # their compute is skipped inside the kernel via pl.when.
        return (0, jnp.minimum(c * tiles_per_chunk + k, num_tiles - 1))

    p_scores, p_idx = pl.pallas_call(
        kernel,
        out_shape=(jax.ShapeDtypeStruct((num_chunks, B, 1), cls_heads.dtype),
                   jax.ShapeDtypeStruct((num_chunks, B, 1), jnp.int32)),
        grid=(num_chunks, tiles_per_chunk),
        in_specs=[pl.BlockSpec((B, tile_n), cls_index_map)],
        out_specs=(pl.BlockSpec((1, B, 1), lambda c, k: (c, 0, 0)),
                   pl.BlockSpec((1, B, 1), lambda c, k: (c, 0, 0))),
        compiler_params=pltpu.CompilerParams(
            dimension_semantics=("parallel", "arbitrary")),
    )(cls_heads)

    p_scores = p_scores[:, :, 0]                                 # (C, B)
    p_idx = p_idx[:, :, 0]                                       # (C, B)

    if num_chunks == 1:
        return p_scores[0], p_idx[0]

    # Combine per-chunk partials; on score ties pick the lowest global index
    # (chunks cover contiguous anchor ranges, so this preserves first occurrence).
    max_scores = jnp.max(p_scores, axis=0)                       # (B,)
    max_idx = jnp.min(jnp.where(p_scores == max_scores[None, :], p_idx, N),
                      axis=0).astype(jnp.int32)                  # (B,)
    return max_scores, max_idx


def _decode_boxes(reg, anc):
    """(B,6) tz_ty_tx_td_th_tw + (B,6) anchors -> (B,6) z1_y1_x1_z2_y2_x2."""
    anchors_dhw = anc[:, 3:] - anc[:, :3]
    anchors_ctr = anc[:, :3] + 0.5 * anchors_dhw
    if BOX_SCALE_FACTOR:
        reg = reg * jnp.asarray(BOX_SCALE_FACTOR, reg.dtype)[None, :]
    pred_dhw = jnp.exp(reg[:, 3:]) * anchors_dhw
    pred_ctr = reg[:, :3] * anchors_dhw + anchors_ctr
    mins = jnp.maximum(pred_ctr - 0.5 * pred_dhw, 0.0)
    hi = jnp.asarray([IMG_SIZE[0] - 1, IMG_SIZE[1] - 1, IMG_SIZE[2] - 1],
                     pred_ctr.dtype)[None, :]
    maxs = jnp.minimum(pred_ctr + 0.5 * pred_dhw, hi)
    return jnp.concatenate([mins, maxs], axis=1)


@jax.jit
def decoder_forward(cls_heads, reg_heads, batch_anchors):
    """cls_heads (B,N), reg_heads (B,N,6), batch_anchors (B,N,6) -> ((B,), (B,6))."""
    B = cls_heads.shape[0]
    max_scores, max_idx = _argmax_pallas(cls_heads)
    # Tiny 6-float-per-batch gather + box decode in plain XLA:
    # reg_heads / batch_anchors are never streamed through VMEM.
    b = jnp.arange(B)
    sel_reg = reg_heads[b, max_idx]
    sel_anc = batch_anchors[b, max_idx]
    return max_scores, _decode_boxes(sel_reg, sel_anc)


# ---------------- pure-JAX reference (mirrors the PyTorch forward) ----------------
def decoder_reference(cls_heads, reg_heads, batch_anchors):
    B = cls_heads.shape[0]
    max_scores = jnp.max(cls_heads, axis=1)
    max_idx = jnp.argmax(cls_heads, axis=1)
    b = jnp.arange(B)
    reg = reg_heads[b, max_idx]
    anc = batch_anchors[b, max_idx]
    return max_scores, _decode_boxes(reg, anc)


if __name__ == "__main__":
    key = jax.random.PRNGKey(0)
    B, N = 2, 2500   # exercises tail masking; small-tile run below covers phantom tiles

    k1, k2, k3, k4 = jax.random.split(key, 4)
    cls_heads = jax.random.uniform(k1, (B, N), dtype=jnp.float32)           # scores in [0,1)
    reg_heads = 0.5 * jax.random.normal(k2, (B, N, 6), dtype=jnp.float32)   # tz ty tx td th tw
    # plausible anchors: (z1,y1,x1,z2,y2,x2) inside a 64^3 volume
    ctr = jax.random.uniform(k3, (B, N, 3), minval=8.0, maxval=56.0, dtype=jnp.float32)
    size = jax.random.uniform(k4, (B, N, 3), minval=4.0, maxval=16.0, dtype=jnp.float32)
    batch_anchors = jnp.concatenate([ctr - 0.5 * size, ctr + 0.5 * size], axis=-1)

    scores, bboxes = decoder_forward(cls_heads, reg_heads, batch_anchors)
    jax.block_until_ready((scores, bboxes))

    ref_idx = jnp.argmax(cls_heads, axis=1).astype(jnp.int32)
    ref_max = jnp.max(cls_heads, axis=1)

    # standalone check of the Pallas max/argmax with the auto (big-tile) config
    pal_scores, pal_idx = _argmax_pallas(cls_heads)
    assert jnp.array_equal(pal_idx, ref_idx)
    assert jnp.allclose(pal_scores, ref_max)

    # force multiple tiles, 2 chunks and a phantom tile to validate those paths
    pal_scores2, pal_idx2 = _argmax_pallas(cls_heads, max_tile_lanes=1024)
    assert jnp.array_equal(pal_idx2, ref_idx)
    assert jnp.allclose(pal_scores2, ref_max)

    ref_scores, ref_bboxes = decoder_reference(cls_heads, reg_heads, batch_anchors)
    assert scores.shape == (B,) and bboxes.shape == (B, 6)
    assert jnp.allclose(scores, ref_scores, atol=1e-5, rtol=1e-5)
    assert jnp.allclose(bboxes, ref_bboxes, atol=1e-4, rtol=1e-4)

    print("KERNEL_OK")
</pallas_src>

<mosaic_0001>
module attributes {stable_mosaic.version = 11 : i64} {
  func.func @_argmax_tile_kernel(%arg0: i32, %arg1: i32, %arg2: memref<2x2560xf32, #tpu.memory_space<vmem>>, %arg3: memref<1x2x1xf32, #tpu.memory_space<vmem>>, %arg4: memref<1x2x1xi32, #tpu.memory_space<vmem>>) attributes {dimension_semantics = [#tpu.dimension_semantics<parallel>, #tpu.dimension_semantics<arbitrary>], iteration_bounds = array<i64: 1, 1>, scalar_prefetch = 0 : i64, scratch_operands = 0 : i64, tpu.core_type = #tpu.core_type<tc>, window_params = [{transform_indices = @transform_0, window_bounds = array<i64: 2, 2560>}, {transform_indices = @transform_1, window_bounds = array<i64: 1, 2, 1>}, {transform_indices = @transform_2, window_bounds = array<i64: 1, 2, 1>}]} {
    %c0_i32 = arith.constant 0 : i32
    %0 = arith.cmpi eq, %arg1, %c0_i32 : i32
    %1 = arith.extui %0 : i1 to i32
    %c0_i32_0 = arith.constant 0 : i32
    %2 = arith.cmpi ne, %1, %c0_i32_0 : i32
    scf.if %2 {
      %cst_17 = arith.constant 0xFF800000 : f32
      %35 = vector.broadcast %cst_17 : f32 to vector<1x2x1xf32>
      %c0_18 = arith.constant 0 : index
      %c0_19 = arith.constant 0 : index
      %c0_20 = arith.constant 0 : index
      %36 = vector.load %arg3[%c0_18, %c0_19, %c0_20] : memref<1x2x1xf32, #tpu.memory_space<vmem>>, vector<1x2x1xf32>
      tpu.vector_store %arg3[%c0_18, %c0_19, %c0_20], %35 {strides = array<i32>} : memref<1x2x1xf32, #tpu.memory_space<vmem>>, vector<1x2x1xf32>,
      %c0_i32_21 = arith.constant 0 : i32
      %37 = vector.broadcast %c0_i32_21 : i32 to vector<1x2x1xi32>
      %c0_22 = arith.constant 0 : index
      %c0_23 = arith.constant 0 : index
      %c0_24 = arith.constant 0 : index
      %38 = vector.load %arg4[%c0_22, %c0_23, %c0_24] : memref<1x2x1xi32, #tpu.memory_space<vmem>>, vector<1x2x1xi32>
      tpu.vector_store %arg4[%c0_22, %c0_23, %c0_24], %37 {strides = array<i32>} : memref<1x2x1xi32, #tpu.memory_space<vmem>>, vector<1x2x1xi32>,
    } else {
    }
    %c1_i32 = arith.constant 1 : i32
    %3 = arith.muli %arg0, %c1_i32 : i32
    %4 = arith.addi %3, %arg1 : i32
    %c0 = arith.constant 0 : index
    %c0_1 = arith.constant 0 : index
    %5 = vector.load %arg2[%c0, %c0_1] : memref<2x2560xf32, #tpu.memory_space<vmem>>, vector<2x2560xf32>
    %6 = tpu.iota {dimensions = array<i32: 1>} : vector<2x2560xi32>
    %c2560_i32 = arith.constant 2560 : i32
    %7 = arith.muli %4, %c2560_i32 : i32
    %8 = vector.broadcast %7 : i32 to vector<2x2560xi32>
    %9 = arith.addi %6, %8 : vector<2x2560xi32>
    %c2500_i32 = arith.constant 2500 : i32
    %10 = vector.broadcast %c2500_i32 : i32 to vector<2x2560xi32>
    %11 = arith.cmpi slt, %9, %10 : vector<2x2560xi32>
    %cst = arith.constant 0xFF800000 : f32
    %12 = vector.broadcast %cst : f32 to vector<2x2560xf32>
    %13 = arith.select %11, %5, %12 : vector<2x2560xi1>, vector<2x2560xf32>
    %cst_2 = arith.constant dense<0xFF800000> : vector<2xf32>
    %14 = vector.multi_reduction <maximumf>, %13, %cst_2 [1] : vector<2x2560xf32> to vector<2xf32>
    %15 = vector.shape_cast %14 : vector<2xf32> to vector<2x1xf32>
    %16 = vector.broadcast %15 : vector<2x1xf32> to vector<2x2560xf32>
    %17 = arith.cmpf oeq, %13, %16 : vector<2x2560xf32>
    %c2500_i32_3 = arith.constant 2500 : i32
    %18 = vector.broadcast %c2500_i32_3 : i32 to vector<2x2560xi32>
    %19 = arith.select %17, %9, %18 : vector<2x2560xi1>, vector<2x2560xi32>
    %cst_4 = arith.constant dense<2147483647> : vector<2xi32>
    %20 = vector.multi_reduction <minsi>, %19, %cst_4 [1] : vector<2x2560xi32> to vector<2xi32>
    %21 = vector.shape_cast %20 : vector<2xi32> to vector<2x1xi32>
    %c0_5 = arith.constant 0 : index
    %c0_6 = arith.constant 0 : index
    %c0_7 = arith.constant 0 : index
    %22 = vector.load %arg3[%c0_5, %c0_6, %c0_7] : memref<1x2x1xf32, #tpu.memory_space<vmem>>, vector<1x2x1xf32>
    %23 = vector.shape_cast %22 : vector<1x2x1xf32> to vector<2x1xf32>
    %24 = arith.cmpf ogt, %15, %23 : vector<2x1xf32>
    %c0_8 = arith.constant 0 : index
    %c0_9 = arith.constant 0 : index
    %c0_10 = arith.constant 0 : index
    %25 = vector.load %arg4[%c0_8, %c0_9, %c0_10] : memref<1x2x1xi32, #tpu.memory_space<vmem>>, vector<1x2x1xi32>
    %26 = vector.shape_cast %25 : vector<1x2x1xi32> to vector<2x1xi32>
    %27 = arith.select %24, %21, %26 : vector<2x1xi1>, vector<2x1xi32>
    %c0_11 = arith.constant 0 : index
    %c0_12 = arith.constant 0 : index
    %c0_13 = arith.constant 0 : index
    %28 = vector.load %arg4[%c0_11, %c0_12, %c0_13] : memref<1x2x1xi32, #tpu.memory_space<vmem>>, vector<1x2x1xi32>
    %29 = vector.shape_cast %28 : vector<1x2x1xi32> to vector<2x1xi32>
    %30 = vector.shape_cast %27 : vector<2x1xi32> to vector<1x2x1xi32>
    tpu.vector_store %arg4[%c0_11, %c0_12, %c0_13], %30 {strides = array<i32>} : memref<1x2x1xi32, #tpu.memory_space<vmem>>, vector<1x2x1xi32>,
    %31 = arith.select %24, %15, %23 : vector<2x1xi1>, vector<2x1xf32>
    %c0_14 = arith.constant 0 : index
    %c0_15 = arith.constant 0 : index
    %c0_16 = arith.constant 0 : index
    %32 = vector.load %arg3[%c0_14, %c0_15, %c0_16] : memref<1x2x1xf32, #tpu.memory_space<vmem>>, vector<1x2x1xf32>
    %33 = vector.shape_cast %32 : vector<1x2x1xf32> to vector<2x1xf32>
    %34 = vector.shape_cast %31 : vector<2x1xf32> to vector<1x2x1xf32>
    tpu.vector_store %arg3[%c0_14, %c0_15, %c0_16], %34 {strides = array<i32>} : memref<1x2x1xf32, #tpu.memory_space<vmem>>, vector<1x2x1xf32>,
    return
  }
  func.func @transform_0(%arg0: i32, %arg1: i32) -> (i32, i32) {
    %c1_i32 = arith.constant 1 : i32
    %0 = arith.muli %arg0, %c1_i32 : i32
    %1 = arith.addi %0, %arg1 : i32
    %c0_i32 = arith.constant 0 : i32
    %2 = arith.minsi %1, %c0_i32 : i32
    %c0_i32_0 = arith.constant 0 : i32
    %c0_i32_1 = arith.constant 0 : i32
    return %c0_i32_0, %2 : i32, i32
  }
  func.func @transform_1(%arg0: i32, %arg1: i32) -> (i32, i32, i32) {
    %c0_i32 = arith.constant 0 : i32
    %c0_i32_0 = arith.constant 0 : i32
    %c0_i32_1 = arith.constant 0 : i32
    return %arg0, %c0_i32, %c0_i32_0 : i32, i32, i32
  }
  func.func @transform_2(%arg0: i32, %arg1: i32) -> (i32, i32, i32) {
    %c0_i32 = arith.constant 0 : i32
    %c0_i32_0 = arith.constant 0 : i32
    %c0_i32_1 = arith.constant 0 : i32
    return %arg0, %c0_i32, %c0_i32_0 : i32, i32, i32
  }
}

</mosaic_0001>

<bundles_post_ra>
// kernel: decoder_forward.1
= control target key start
LH: loop header
LB: loop body
LE: loop exit
PB: predicated region body
PF: predicated region fallthrough
CT: control target
= control target key end

     0   :  { %8 = vsyncpa [#allocation3], 0  ;;  %s383_s12 = smov [#allocation2]   ;;  %s666_s0 = inlined_call_operand.hbm [shape: f32[2,2500], index: 0, kind: input, shape index: {}]   ;;  %s667_s1 = inlined_call_operand.vmem [shape: f32[1,2,1], index: 1, kind: output, shape index: {0}]   ;;  %s668_s2 = inlined_call_operand.vmem [shape: s32[1,2,1], index: 2, kind: output, shape index: {1}]  }
   0x1   :  { %s20_s11 = sshll.u32 %s666_s0, 4  ;;  %s22_s13 = sshll.u32 %s383_s12, 4  ;;  %s21_s11 = int_to_ptr.hbm [resolvable:$true] %s20_s11  ;;  %s23_s13 = int_to_ptr.vmem [resolvable:$true] %s22_s13 }
   0x2   :  { %25 = dma.hbm_to_vmem [thread:$0]  %s21_s11, 640, %s23_s13, [#allocation3]  }
   0x3   :  { %381 = dma.done.wait [#allocation3], 640  }
   0x4   :  { %382 = vsyncadd [#allocation3], 4294966656  ;;  %v42_v0 = vld [vmem:[#allocation2] sm:$0xff]  ;;  %v43_v1 = vld [vmem:[#allocation2 + $0x8] sm:$0xff]  ;;  %vm670_vm0 = vcmask 1041408   ;;  %v47_v12 = vlaneseq  ;;  %vm669_vm2 = vcmask 1024  }
   0x5   :  { %115 = vst [vmem:[#allocation1] ss:$4 sm:$0xff] %v42_v0  ;;  %v44_v2 = vld [vmem:[#allocation2 + $0x10] sm:$0xff]  ;;  %v45_v3 = vld [vmem:[#allocation2 + $0x18] sm:$0xff]  ;;  %v46_v17 = vld [vmem:[#allocation2 + $0x20] sm:$0xff] }
   0x6   :  { %117 = vst [vmem:[#allocation1 + $0x20] ss:$4 sm:$0xff] %v43_v1  ;;  %v444_v26 = vand.u32 127, %v47_v12  ;;  %v384_v12 = vmov -inf  }
   0x7   :  { %39 = vst.msk [vmem:[%s667_s1] sm:$0x3] %vm669_vm2, %v384_v12 }
   0x8   :  { %v463_v39 = vadd.s32 2432, %v444_v26 }
   0xa   :  { %vm109_vm1 = vcmp.lt.s32.totalorder %v463_v39, 2500 }
   0xc   :  { %v404_v4 = vld.sshfl [vmem:[#allocation1] sm:$0xff pattern:$0x73625140]  ;;  %v406_v5 = vld.sshfl [vmem:[#allocation1 + $0x8] sm:$0xff pattern:$0x73625140] }
   0xd   :  { %v408_v6 = vld.sshfl [vmem:[#allocation1 + $0x10] sm:$0xff pattern:$0x73625140]  ;;  %v410_v7 = vld.sshfl [vmem:[#allocation1 + $0x18] sm:$0xff pattern:$0x73625140] }
   0xe   :  { %v412_v8 = vld.sshfl [vmem:[#allocation1 + $0x20] sm:$0xff pattern:$0x73625140]  ;;  %v414_v9 = vld.sshfl [vmem:[#allocation1 + $0x28] sm:$0xff pattern:$0x73625140] }
   0xf   :  { %v416_v10 = vld.sshfl [vmem:[#allocation1 + $0x30] sm:$0xff pattern:$0x73625140]  ;;  %v418_v11 = vld.sshfl [vmem:[#allocation1 + $0x38] sm:$0xff pattern:$0x73625140] }
  0x10   :  { %126 = vst [vmem:[#allocation1] ss:$4 sm:$0xff] %v44_v2  ;;  %v182_v13 = vsel %vm670_vm0, %v404_v4, -inf  ;;  %v183_v14 = vsel %vm670_vm0, %v406_v5, -inf  ;;  %v184_v15 = vsel %vm670_vm0, %v408_v6, -inf  ;;  %v185_v16 = vsel %vm670_vm0, %v410_v7, -inf }
  0x11   :  { %127 = vst [vmem:[#allocation1 + $0x20] ss:$4 sm:$0xff] %v45_v3  ;;  %v186_v18 = vsel %vm670_vm0, %v412_v8, -inf  ;;  %v188_v19 = vsel %vm670_vm0, %v414_v9, -inf  ;;  %v190_v20 = vsel %vm670_vm0, %v416_v10, -inf  ;;  %v192_v21 = vsel %vm670_vm0, %v418_v11, -inf }
  0x12   :  { %v187_v28 = vmax.f32 %v182_v13, %v186_v18  ;;  %v189_v29 = vmax.f32 %v183_v14, %v188_v19  ;;  %v191_v30 = vmax.f32 %v184_v15, %v190_v20  ;;  %v193_v33 = vmax.f32 %v185_v16, %v192_v21 }
  0x13   :  { %v49_v13 = vadd.s32 128, %v444_v26  ;;  %v50_v14 = vadd.s32 256, %v444_v26  ;;  %v51_v15 = vadd.s32 384, %v444_v26  ;;  %v52_v16 = vadd.s32 512, %v444_v26 }
  0x14   :  { %v54_v18 = vadd.s32 768, %v444_v26  ;;  %v55_v19 = vadd.s32 896, %v444_v26  ;;  %v56_v20 = vadd.s32 1024, %v444_v26  ;;  %v57_v21 = vadd.s32 1152, %v444_v26 }
  0x17   :  { %v436_v22 = vld.sshfl [vmem:[#allocation1] sm:$0xff pattern:$0x73625140]  ;;  %v438_v23 = vld.sshfl [vmem:[#allocation1 + $0x8] sm:$0xff pattern:$0x73625140] }
  0x18   :  { %v440_v24 = vld.sshfl [vmem:[#allocation1 + $0x10] sm:$0xff pattern:$0x73625140]  ;;  %v442_v25 = vld.sshfl [vmem:[#allocation1 + $0x18] sm:$0xff pattern:$0x73625140] }
  0x19   :  { %v446_v27 = vld.sshfl [vmem:[#allocation1 + $0x20] sm:$0xff pattern:$0x73625140]  ;;  %v448_v31 = vld.sshfl [vmem:[#allocation1 + $0x28] sm:$0xff pattern:$0x73625140] }
  0x1a   :  { %v450_v32 = vld.sshfl [vmem:[#allocation1 + $0x30] sm:$0xff pattern:$0x73625140]  ;;  %136 = vst [vmem:[#allocation1] ss:$4 sm:$0xff] %v46_v17  ;;  %v194_v34 = vsel %vm670_vm0, %v436_v22, -inf }
  0x1b   :  { %v196_v35 = vsel %vm670_vm0, %v438_v23, -inf  ;;  %v198_v36 = vsel %vm670_vm0, %v440_v24, -inf  ;;  %v200_v37 = vsel %vm670_vm0, %v442_v25, -inf  ;;  %v460_v38 = vld.sshfl [vmem:[#allocation1 + $0x38] sm:$0xff pattern:$0x73625140]  ;;  %v195_v40 = vmax.f32 %v187_v28, %v194_v34 }
  0x1c   :  { %v197_v41 = vmax.f32 %v189_v29, %v196_v35  ;;  %v199_v42 = vmax.f32 %v191_v30, %v198_v36  ;;  %v201_v43 = vmax.f32 %v193_v33, %v200_v37  ;;  %v202_v44 = vsel %vm670_vm0, %v446_v27, -inf }
  0x1d   :  { %v204_v45 = vsel %vm670_vm0, %v448_v31, -inf  ;;  %v206_v46 = vsel %vm670_vm0, %v450_v32, -inf  ;;  %v208_v47 = vsel %vm670_vm0, %v460_v38, -inf  ;;  %v203_v48 = vmax.f32 %v195_v40, %v202_v44 }
  0x1e   :  { %v205_v49 = vmax.f32 %v197_v41, %v204_v45  ;;  %v207_v50 = vmax.f32 %v199_v42, %v206_v46  ;;  %v209_v53 = vmax.f32 %v201_v43, %v208_v47  ;;  %v53_v17 = vadd.s32 640, %v444_v26 }
  0x1f   :  { %v58_v28 = vadd.s32 1280, %v444_v26  ;;  %v59_v29 = vadd.s32 1408, %v444_v26  ;;  %v60_v30 = vadd.s32 1536, %v444_v26  ;;  %v61_v33 = vadd.s32 1664, %v444_v26 }
  0x20   :  { %v62_v34 = vadd.s32 1792, %v444_v26  ;;  %v63_v36 = vadd.s32 1920, %v444_v26  ;;  %v64_v37 = vadd.s32 2048, %v444_v26  ;;  %v65_v40 = vadd.s32 2176, %v444_v26 }
  0x21   :  { %v474_v51 = vld.sshfl [vmem:[#allocation1] sm:$0xff pattern:$0x73625140]  ;;  %v476_v52 = vld.sshfl [vmem:[#allocation1 + $0x8] sm:$0xff pattern:$0x73625140] }
  0x22   :  { %v478_v54 = vld.sshfl [vmem:[#allocation1 + $0x10] sm:$0xff pattern:$0x73625140]  ;;  %v140_v55 = vld.sshfl [vmem:[#allocation1 + $0x18] sm:$0xff pattern:$0x73625140] }
  0x23   :  { %v480_v56 = vsel %vm109_vm1, %v140_v55, -inf  ;;  %v210_v57 = vsel %vm670_vm0, %v474_v51, -inf  ;;  %v212_v58 = vsel %vm670_vm0, %v476_v52, -inf  ;;  %v214_v59 = vsel %vm670_vm0, %v478_v54, -inf }
  0x24   :  { %v211_v60 = vmax.f32 %v203_v48, %v210_v57  ;;  %v213_v61 = vmax.f32 %v205_v49, %v212_v58  ;;  %v215_v62 = vmax.f32 %v207_v50, %v214_v59  ;;  %v216_v63 = vsel %vm670_vm0, %v480_v56, -inf }
  0x25   :  { %v217_v0 = vmax.f32 %v209_v53, %v216_v63  ;;  %v66_v41 = vadd.s32 2304, %v444_v26 }
  0x26   :  { %v218_v1 = vmax.f32 %v211_v60, %v213_v61 }
  0x27   :  { %v219_v2 = vmax.f32 %v215_v62, %v217_v0 }
  0x29   :  { %v220_v3 = vmax.f32 %v218_v1, %v219_v2 }
  0x2b   :  { %221 = vmax.xlane.f32.xlu0 %v220_v3 }
  0x9e   :  { %v508_v35 = vpop.xlane.xlu0 %221 }
  0x9f   :  { %vm223_vm3 = vcmp.eq.f32.partialorder %v404_v4, %v508_v35  ;;  %vm224_vm4 = vcmp.eq.f32.partialorder %v406_v5, %v508_v35  ;;  %vm225_vm5 = vcmp.eq.f32.partialorder %v408_v6, %v508_v35  ;;  %vm226_vm6 = vcmp.eq.f32.partialorder %v410_v7, %v508_v35 }
  0xa0   :  { %vm227_vm7 = vcmp.eq.f32.partialorder %v412_v8, %v508_v35  ;;  %vm228_vm8 = vcmp.eq.f32.partialorder %v414_v9, %v508_v35  ;;  %vm229_vm9 = vcmp.eq.f32.partialorder %v416_v10, %v508_v35  ;;  %vm230_vm10 = vcmp.eq.f32.partialorder %v418_v11, %v508_v35  ;;  %v594_v11 = vld [vmem:[%s667_s1] sm:$0x3] }
  0xa1   :  { %vm231_vm11 = vcmp.eq.f32.partialorder %v436_v22, %v508_v35  ;;  %vm236_vm1 = vcmp.eq.f32.partialorder %v448_v31, %v508_v35  ;;  %vm237_vm2 = vcmp.eq.f32.partialorder %v450_v32, %v508_v35  ;;  %vm238_vm0 = vcmp.eq.f32.partialorder %v460_v38, %v508_v35 }
  0xa2   :  { %vm239_vm12 = vcmp.eq.f32.partialorder %v474_v51, %v508_v35  ;;  %vm240_vm13 = vcmp.eq.f32.partialorder %v476_v52, %v508_v35  ;;  %vm241_vm14 = vcmp.eq.f32.partialorder %v478_v54, %v508_v35  ;;  %vm242_vm15 = vcmp.eq.f32.partialorder %v480_v56, %v508_v35 }
  0xa3   :  { %v243_v42 = vsel %vm223_vm3, %v444_v26, 2500  ;;  %v244_v43 = vsel %vm224_vm4, %v49_v13, 2500  ;;  %v245_v44 = vsel %vm225_vm5, %v50_v14, 2500  ;;  %v246_v45 = vsel %vm226_vm6, %v51_v15, 2500 }
  0xa4   :  { %v247_v46 = vsel %vm227_vm7, %v52_v16, 2500  ;;  %v248_v4 = vsel %vm228_vm8, %v53_v17, 2500  ;;  %v249_v5 = vsel %vm229_vm9, %v54_v18, 2500  ;;  %v250_v6 = vsel %vm230_vm10, %v55_v19, 2500 }
  0xa5   :  { %v251_v7 = vsel %vm231_vm11, %v56_v20, 2500  ;;  %vm671_vm3 = vcmp.eq.f32.partialorder %v438_v23, %v508_v35  ;;  %vm672_vm4 = vcmp.eq.f32.partialorder %v440_v24, %v508_v35  ;;  %vm673_vm5 = vcmp.eq.f32.partialorder %v442_v25, %v508_v35 }
  0xa6   :  { %v252_v8 = vsel %vm671_vm3, %v57_v21, 2500  ;;  %v253_v9 = vsel %vm672_vm4, %v58_v28, 2500  ;;  %v254_v10 = vsel %vm673_vm5, %v59_v29, 2500  ;;  %vm674_vm6 = vcmp.eq.f32.partialorder %v446_v27, %v508_v35 }
  0xa7   :  { %v255_v22 = vsel %vm674_vm6, %v60_v30, 2500  ;;  %v256_v23 = vsel %vm236_vm1, %v61_v33, 2500  ;;  %v257_v24 = vsel %vm237_vm2, %v62_v34, 2500  ;;  %v258_v25 = vsel %vm238_vm0, %v63_v36, 2500 }
  0xa8   :  { %v259_v26 = vsel %vm239_vm12, %v64_v37, 2500  ;;  %v260_v27 = vsel %vm240_vm13, %v65_v40, 2500  ;;  %v261_v31 = vsel %vm241_vm14, %v66_v41, 2500  ;;  %v262_v32 = vsel %vm242_vm15, %v463_v39, 2500 }
  0xa9   :  { %vm675_vm2 = vcmask 1041408   ;;  %vm336_vm8 = vcmp.gt.f32.partialorder %v508_v35, %v594_v11  ;;  %vm683_vm1 = vcmask 1024  }
  0xaa   :  { %v263_v38 = vsel %vm675_vm2, %v243_v42, 2147483647  ;;  %vm676_vm0 = vmmov %vm675_vm2  ;;  %v341_v39 = vsel %vm336_vm8, %v508_v35, %v594_v11  ;;  %v385_v42 = vmov 0  }
  0xab   :  { %v264_v47 = vsel %vm676_vm0, %v244_v43, 2147483647  ;;  %vm677_vm7 = vmmov %vm676_vm0  ;;  %342 = vst.msk [vmem:[%s667_s1] sm:$0x3] %vm683_vm1, %v341_v39 }
  0xac   :  { %v265_v48 = vsel %vm677_vm7, %v245_v44, 2147483647  ;;  %vm678_vm9 = vmmov %vm676_vm0 }
  0xad   :  { %v266_v49 = vsel %vm678_vm9, %v246_v45, 2147483647  ;;  %vm679_vm10 = vmmov %vm676_vm0 }
  0xae   :  { %v267_v50 = vsel %vm679_vm10, %v247_v46, 2147483647  ;;  %vm680_vm11 = vmmov %vm676_vm0 }
  0xaf   :  { %v270_v51 = vsel %vm680_vm11, %v248_v4, 2147483647  ;;  %vm268_vm12 = vcmp.lt.s32.totalorder %v263_v38, %v267_v50  ;;  %vm681_vm14 = vmmov %vm676_vm0 }
  0xb0   :  { %vm271_vm13 = vcmp.lt.s32.totalorder %v264_v47, %v270_v51  ;;  %v273_v52 = vsel %vm681_vm14, %v249_v5, 2147483647  ;;  %vm682_vm15 = vmmov %vm676_vm0  ;;  %v269_v54 = vsel %vm268_vm12, %v263_v38, %v267_v50 }
  0xb1   :  { %v276_v53 = vsel %vm682_vm15, %v250_v6, 2147483647  ;;  %v272_v55 = vsel %vm271_vm13, %v264_v47, %v270_v51  ;;  %vm274_vm3 = vcmp.lt.s32.totalorder %v265_v48, %v273_v52  ;;  %vm684_vm5 = vmmov %vm676_vm0 }
  0xb2   :  { %vm277_vm4 = vcmp.lt.s32.totalorder %v266_v49, %v276_v53  ;;  %v275_v56 = vsel %vm274_vm3, %v265_v48, %v273_v52  ;;  %v279_v58 = vsel %vm684_vm5, %v251_v7, 2147483647  ;;  %vm685_vm6 = vmmov %vm676_vm0 }
  0xb3   :  { %v278_v57 = vsel %vm277_vm4, %v266_v49, %v276_v53  ;;  %v282_v59 = vsel %vm685_vm6, %v252_v8, 2147483647  ;;  %vm280_vm2 = vcmp.lt.s32.totalorder %v269_v54, %v279_v58  ;;  %vm686_vm7 = vmmov %vm684_vm5 }
  0xb4   :  { %vm283_vm0 = vcmp.lt.s32.totalorder %v272_v55, %v282_v59  ;;  %v285_v60 = vsel %vm686_vm7, %v253_v9, 2147483647  ;;  %vm687_vm9 = vmmov %vm684_vm5  ;;  %v281_v62 = vsel %vm280_vm2, %v269_v54, %v279_v58 }
  0xb5   :  { %v288_v61 = vsel %vm687_vm9, %v254_v10, 2147483647  ;;  %v284_v63 = vsel %vm283_vm0, %v272_v55, %v282_v59  ;;  %vm286_vm10 = vcmp.lt.s32.totalorder %v275_v56, %v285_v60  ;;  %vm688_vm12 = vmmov %vm684_vm5 }
  0xb6   :  { %vm289_vm11 = vcmp.lt.s32.totalorder %v278_v57, %v288_v61  ;;  %v287_v0 = vsel %vm286_vm10, %v275_v56, %v285_v60  ;;  %v291_v2 = vsel %vm688_vm12, %v255_v22, 2147483647  ;;  %vm689_vm13 = vmmov %vm684_vm5 }
  0xb7   :  { %v290_v1 = vsel %vm289_vm11, %v278_v57, %v288_v61  ;;  %v294_v3 = vsel %vm689_vm13, %v256_v23, 2147483647  ;;  %vm292_vm14 = vcmp.lt.s32.totalorder %v281_v62, %v291_v2  ;;  %vm690_vm1 = vmmov %vm684_vm5 }
  0xb8   :  { %vm295_vm15 = vcmp.lt.s32.totalorder %v284_v63, %v294_v3  ;;  %v297_v12 = vsel %vm690_vm1, %v257_v24, 2147483647  ;;  %vm691_vm3 = vmmov %vm690_vm1  ;;  %v293_v14 = vsel %vm292_vm14, %v281_v62, %v291_v2 }
  0xb9   :  { %v300_v13 = vsel %vm691_vm3, %v258_v25, 2147483647  ;;  %v296_v15 = vsel %vm295_vm15, %v284_v63, %v294_v3  ;;  %vm298_vm4 = vcmp.lt.s32.totalorder %v287_v0, %v297_v12  ;;  %vm692_vm6 = vmmov %vm690_vm1 }
  0xba   :  { %vm301_vm5 = vcmp.lt.s32.totalorder %v290_v1, %v300_v13  ;;  %v299_v16 = vsel %vm298_vm4, %v287_v0, %v297_v12  ;;  %v303_v18 = vsel %vm692_vm6, %v259_v26, 2147483647  ;;  %vm693_vm2 = vmmov %vm690_vm1 }
  0xbb   :  { %v302_v17 = vsel %vm301_vm5, %v290_v1, %v300_v13  ;;  %v306_v19 = vsel %vm693_vm2, %v260_v27, 2147483647  ;;  %vm304_vm0 = vcmp.lt.s32.totalorder %v293_v14, %v303_v18  ;;  %vm694_vm9 = vmmov %vm690_vm1 }
  0xbc   :  { %vm307_vm7 = vcmp.lt.s32.totalorder %v296_v15, %v306_v19  ;;  %v309_v20 = vsel %vm694_vm9, %v261_v31, 2147483647  ;;  %vm695_vm10 = vmmov %vm690_vm1  ;;  %v305_v28 = vsel %vm304_vm0, %v293_v14, %v303_v18  ;;  %vm696_vm1 = vcmask 1024  }
  0xbd   :  { %v312_v21 = vsel %vm695_vm10, %v262_v32, 2147483647  ;;  %v308_v29 = vsel %vm307_vm7, %v296_v15, %v306_v19  ;;  %vm310_vm11 = vcmp.lt.s32.totalorder %v299_v16, %v309_v20  ;;  %40 = vst.msk [vmem:[%s668_s2] sm:$0x3] %vm696_vm1, %v385_v42  ;;  %vm697_vm4 = vmmov %vm696_vm1 }
  0xbe   :  { %vm313_vm12 = vcmp.lt.s32.totalorder %v302_v17, %v312_v21  ;;  %v311_v30 = vsel %vm310_vm11, %v299_v16, %v309_v20  ;;  %vm315_vm13 = vcmp.lt.s32.totalorder %v305_v28, %v308_v29 }
  0xbf   :  { %v314_v33 = vsel %vm313_vm12, %v302_v17, %v312_v21  ;;  %v316_v34 = vsel %vm315_vm13, %v305_v28, %v308_v29 }
  0xc0   :  { %vm317_vm14 = vcmp.lt.s32.totalorder %v311_v30, %v314_v33 }
  0xc1   :  { %v318_v36 = vsel %vm317_vm14, %v311_v30, %v314_v33 }
  0xc2   :  { %vm319_vm15 = vcmp.lt.s32.totalorder %v316_v34, %v318_v36 }
  0xc3   :  { %v320_v37 = vsel %vm319_vm15, %v316_v34, %v318_v36 }
  0xc4   :  { %v322_v40 = vshra.s32 %v320_v37, 16  ;;  %v321_v43 = vand.u32 65535, %v320_v37  ;;  %v337_v8 = vld [vmem:[%s668_s2] sm:$0x3] }
  0xc6   :  { %v324_v41 = vcvt.s32.f32 %v322_v40  ;;  %v323_v45 = vcvt.s32.f32 %v321_v43 }
  0xc8   :  { %325 = vmin.xlane.f32.xlu0 %v324_v41 }
 0x13b   :  { %v326_v44 = vpop.xlane.xlu0 %325 }
 0x13c   :  { %vm327_vm3 = vcmp.eq.f32.partialorder %v324_v41, %v326_v44  ;;  %v332_v4 = vcvt.f32.s32 %v326_v44 }
 0x13d   :  { %v328_v46 = vsel %vm327_vm3, %v323_v45, inf }
 0x13e   :  { %329 = vmin.xlane.f32.xlu1 %v328_v46  ;;  %v333_v6 = vshll.u32 %v332_v4, 16 }
 0x1b1   :  { %v330_v5 = vpop.xlane.xlu1 %329 }
 0x1b2   :  { %v331_v7 = vcvt.f32.s32 %v330_v5 }
 0x1b4   :  { %v334_v9 = vadd.s32 %v333_v6, %v331_v7 }
 0x1b6   :  { %v338_v10 = vsel %vm336_vm8, %v334_v9, %v337_v8 }
 0x1b7   :  { %340 = vst.msk [vmem:[%s668_s2] sm:$0x3] %vm697_vm4, %v338_v10 }
 0x1b8   :  { %351 = vsyncpa [#allocation3], 1 }

</bundles_post_ra>
